<compile_context>
chip_gen: v5e
topology: v5e:2x2
jax: 0.10.0
libtpu: 0.0.40
codegen_flags: <defaults>
</compile_context>

<pallas_src>
import jax
import jax.numpy as jnp
from jax.experimental import pallas as pl
from jax.experimental.pallas import tpu as pltpu

_LANES = 1024          # lane-dense last dim (large multiple of 128)
_MAX_TILE_ROWS = 512   # (512, 1024) f32 tile = 2 MiB


def _round_up(a, b):
    return ((a + b - 1) // b) * b


def _reduce_kernel(x_ref, m_ref, s_ref):
    """Online global max / sum-of-exp over row tiles.

    m_ref / s_ref are (1, 1) outputs whose block index is constant across the
    grid, so they stay resident in VMEM for the whole reduction and serve as
    the running accumulators (P3 pattern).
    """
    @pl.when(pl.program_id(0) == 0)
    def _():
        m_ref[...] = jnp.full_like(m_ref, -jnp.inf)
        s_ref[...] = jnp.zeros_like(s_ref)

    xf = x_ref[...].astype(jnp.float32)                    # (TR, C)

    # Staged reductions (lane reduce then sublane reduce) -> (1, 1).
    tile_m = jnp.max(xf, axis=1, keepdims=True)            # (TR, 1)
    tile_m = jnp.max(tile_m, axis=0, keepdims=True)        # (1, 1)

    m_old = m_ref[...]
    m_new = jnp.maximum(m_old, tile_m)

    p = jnp.exp(xf - m_new)                                # padded -inf -> 0
    tile_s = jnp.sum(p, axis=1, keepdims=True)             # (TR, 1)
    tile_s = jnp.sum(tile_s, axis=0, keepdims=True)        # (1, 1)

    # Rescale the running sum for the new max, then accumulate this tile.
    s_ref[...] = jnp.exp(m_old - m_new) * s_ref[...] + tile_s
    m_ref[...] = m_new


def _normalize_kernel(m_ref, inv_s_ref, x_ref, o_ref):
    """o = exp(x - m) * inv_s; m and inv_s are scalars read once from SMEM."""
    m = m_ref[0, 0]
    inv_s = inv_s_ref[0, 0]
    xf = x_ref[...].astype(jnp.float32)
    # Multiply by the precomputed reciprocal (VPU) instead of a per-element
    # divide, keeping the EUP slot free for exp.
    o_ref[...] = (jnp.exp(xf - m) * inv_s).astype(o_ref.dtype)


def softmax_stable(x):
    """Global stable softmax, equivalent to the PyTorch SoftmaxStable module."""
    orig_shape = x.shape
    n = x.size
    c = _LANES
    rows = pl.cdiv(n, c)
    tr = _MAX_TILE_ROWS if rows >= _MAX_TILE_ROWS else _round_up(rows, 8)
    r = _round_up(rows, tr)
    grid = (r // tr,)

    # Flatten + pad to a lane-dense slab. Padding is -inf: it never wins the
    # global max and exp(-inf - m) == 0 for any finite m, so the sum is exact.
    flat = x.reshape(-1)
    pad = r * c - n
    if pad:
        flat = jnp.concatenate(
            [flat, jnp.full((pad,), -jnp.inf, dtype=x.dtype)])
    slab = flat.reshape(r, c)

    vmem_limit = 32 * 1024 * 1024  # fits v5e/v6e/v7x with headroom

    # ---- Pass 1: global max + sum-of-exp (online, "arbitrary" axis) --------
    m, s = pl.pallas_call(
        _reduce_kernel,
        out_shape=(jax.ShapeDtypeStruct((1, 1), jnp.float32),
                   jax.ShapeDtypeStruct((1, 1), jnp.float32)),
        grid=grid,
        in_specs=[pl.BlockSpec((tr, c), lambda i: (i, 0))],
        out_specs=(pl.BlockSpec((1, 1), lambda i: (0, 0)),
                   pl.BlockSpec((1, 1), lambda i: (0, 0))),
        compiler_params=pltpu.CompilerParams(
            dimension_semantics=("arbitrary",),
            vmem_limit_bytes=vmem_limit),
    )(slab)

    # Single scalar reciprocal outside the hot loop; both scalars are handed
    # to pass 2 through SMEM (no per-tile VMEM load / broadcast).
    inv_s = (1.0 / s).astype(jnp.float32)

    # ---- Pass 2: lane-dense normalize (independent tiles, "parallel") ------
    out_slab = pl.pallas_call(
        _normalize_kernel,
        out_shape=jax.ShapeDtypeStruct((r, c), x.dtype),
        grid=grid,
        in_specs=[
            pl.BlockSpec(memory_space=pltpu.MemorySpace.SMEM),   # m
            pl.BlockSpec(memory_space=pltpu.MemorySpace.SMEM),   # inv_s
            pl.BlockSpec((tr, c), lambda i: (i, 0)),             # x tile
        ],
        out_specs=pl.BlockSpec((tr, c), lambda i: (i, 0)),
        compiler_params=pltpu.CompilerParams(
            dimension_semantics=("parallel",),
            vmem_limit_bytes=vmem_limit),
    )(m, inv_s, slab)

    return out_slab.reshape(-1)[:n].reshape(orig_shape)


def _reference(x):
    c = jnp.max(x)
    e = jnp.exp(x - c)
    return e / jnp.sum(e)


if __name__ == "__main__":
    key = jax.random.PRNGKey(0)
    k0, k1, k2 = jax.random.split(key, 3)

    # Small shape consistent with the module: seq=8, hidden=32.
    x = jax.random.normal(k0, (8, 32), dtype=jnp.float32)
    y = jax.block_until_ready(softmax_stable(x))
    ref = _reference(x)
    assert y.shape == x.shape and y.dtype == x.dtype
    assert jnp.allclose(y, ref, atol=1e-6, rtol=1e-6)
    assert jnp.allclose(jnp.sum(y), 1.0, atol=1e-5)

    # Multi-dim input (batch=2, channels=4, spatial=16x16): exercises the
    # flatten + pad path.
    x2 = jax.random.normal(k1, (2, 4, 16, 16), dtype=jnp.float32)
    y2 = jax.block_until_ready(softmax_stable(x2))
    assert jnp.allclose(y2, _reference(x2), atol=1e-6, rtol=1e-6)

    # Larger-than-one-tile input: exercises the multi-step online reduction
    # (grid of 2 row tiles) and the padded tail.
    x3 = jax.random.normal(k2, (600, 1024), dtype=jnp.float32)
    y3 = jax.block_until_ready(softmax_stable(x3))
    assert jnp.allclose(y3, _reference(x3), rtol=1e-5, atol=1e-12)

    print("KERNEL_OK")
</pallas_src>

<mosaic_0001>
module attributes {stable_mosaic.version = 11 : i64} {
  func.func @_reduce_kernel(%arg0: i32, %arg1: memref<8x1024xf32, #tpu.memory_space<vmem>>, %arg2: memref<1x1xf32, #tpu.memory_space<vmem>>, %arg3: memref<1x1xf32, #tpu.memory_space<vmem>>) attributes {dimension_semantics = [#tpu.dimension_semantics<arbitrary>], iteration_bounds = array<i64: 1>, scalar_prefetch = 0 : i64, scratch_operands = 0 : i64, tpu.core_type = #tpu.core_type<tc>, window_params = [{transform_indices = @transform_0, window_bounds = array<i64: 8, 1024>}, {pipeline_mode = #tpu.pipeline_mode<synchronous>, transform_indices = @transform_1, window_bounds = array<i64: 1, 1>}, {pipeline_mode = #tpu.pipeline_mode<synchronous>, transform_indices = @transform_2, window_bounds = array<i64: 1, 1>}]} {
    %c0_i32 = arith.constant 0 : i32
    %0 = arith.cmpi eq, %arg0, %c0_i32 : i32
    %1 = arith.extui %0 : i1 to i32
    %c0_i32_0 = arith.constant 0 : i32
    %2 = arith.cmpi ne, %1, %c0_i32_0 : i32
    scf.if %2 {
      %cst_13 = arith.constant 0xFF800000 : f32
      %24 = vector.broadcast %cst_13 : f32 to vector<1x1xf32>
      %c0_14 = arith.constant 0 : index
      %c0_15 = arith.constant 0 : index
      %25 = vector.load %arg2[%c0_14, %c0_15] : memref<1x1xf32, #tpu.memory_space<vmem>>, vector<1x1xf32>
      tpu.vector_store %arg2[%c0_14, %c0_15], %24 {strides = array<i32>} : memref<1x1xf32, #tpu.memory_space<vmem>>, vector<1x1xf32>,
      %cst_16 = arith.constant 0.000000e+00 : f32
      %26 = vector.broadcast %cst_16 : f32 to vector<1x1xf32>
      %c0_17 = arith.constant 0 : index
      %c0_18 = arith.constant 0 : index
      %27 = vector.load %arg3[%c0_17, %c0_18] : memref<1x1xf32, #tpu.memory_space<vmem>>, vector<1x1xf32>
      tpu.vector_store %arg3[%c0_17, %c0_18], %26 {strides = array<i32>} : memref<1x1xf32, #tpu.memory_space<vmem>>, vector<1x1xf32>,
    } else {
    }
    %c0 = arith.constant 0 : index
    %c0_1 = arith.constant 0 : index
    %3 = vector.load %arg1[%c0, %c0_1] : memref<8x1024xf32, #tpu.memory_space<vmem>>, vector<8x1024xf32>
    %cst = arith.constant dense<0xFF800000> : vector<8xf32>
    %4 = vector.multi_reduction <maximumf>, %3, %cst [1] : vector<8x1024xf32> to vector<8xf32>
    %5 = vector.shape_cast %4 : vector<8xf32> to vector<8x1xf32>
    %cst_2 = arith.constant dense<0xFF800000> : vector<1xf32>
    %6 = vector.multi_reduction <maximumf>, %5, %cst_2 [0] : vector<8x1xf32> to vector<1xf32>
    %7 = vector.shape_cast %6 : vector<1xf32> to vector<1x1xf32>
    %c0_3 = arith.constant 0 : index
    %c0_4 = arith.constant 0 : index
    %8 = vector.load %arg2[%c0_3, %c0_4] : memref<1x1xf32, #tpu.memory_space<vmem>>, vector<1x1xf32>
    %9 = arith.maximumf %8, %7 : vector<1x1xf32>
    %10 = vector.broadcast %9 : vector<1x1xf32> to vector<8x1024xf32>
    %11 = arith.subf %3, %10 : vector<8x1024xf32>
    %12 = math.exp %11 : vector<8x1024xf32>
    %cst_5 = arith.constant dense<0.000000e+00> : vector<8xf32>
    %13 = vector.multi_reduction <add>, %12, %cst_5 [1] : vector<8x1024xf32> to vector<8xf32>
    %14 = vector.shape_cast %13 : vector<8xf32> to vector<8x1xf32>
    %cst_6 = arith.constant dense<0.000000e+00> : vector<1xf32>
    %15 = vector.multi_reduction <add>, %14, %cst_6 [0] : vector<8x1xf32> to vector<1xf32>
    %16 = vector.shape_cast %15 : vector<1xf32> to vector<1x1xf32>
    %17 = arith.subf %8, %9 : vector<1x1xf32>
    %18 = math.exp %17 : vector<1x1xf32>
    %c0_7 = arith.constant 0 : index
    %c0_8 = arith.constant 0 : index
    %19 = vector.load %arg3[%c0_7, %c0_8] : memref<1x1xf32, #tpu.memory_space<vmem>>, vector<1x1xf32>
    %20 = arith.mulf %18, %19 : vector<1x1xf32>
    %21 = arith.addf %20, %16 : vector<1x1xf32>
    %c0_9 = arith.constant 0 : index
    %c0_10 = arith.constant 0 : index
    %22 = vector.load %arg3[%c0_9, %c0_10] : memref<1x1xf32, #tpu.memory_space<vmem>>, vector<1x1xf32>
    tpu.vector_store %arg3[%c0_9, %c0_10], %21 {strides = array<i32>} : memref<1x1xf32, #tpu.memory_space<vmem>>, vector<1x1xf32>,
    %c0_11 = arith.constant 0 : index
    %c0_12 = arith.constant 0 : index
    %23 = vector.load %arg2[%c0_11, %c0_12] : memref<1x1xf32, #tpu.memory_space<vmem>>, vector<1x1xf32>
    tpu.vector_store %arg2[%c0_11, %c0_12], %9 {strides = array<i32>} : memref<1x1xf32, #tpu.memory_space<vmem>>, vector<1x1xf32>,
    return
  }
  func.func @transform_0(%arg0: i32) -> (i32, i32) {
    %c0_i32 = arith.constant 0 : i32
    %c0_i32_0 = arith.constant 0 : i32
    return %arg0, %c0_i32 : i32, i32
  }
  func.func @transform_1(%arg0: i32) -> (i32, i32) {
    %c0_i32 = arith.constant 0 : i32
    %c0_i32_0 = arith.constant 0 : i32
    %c0_i32_1 = arith.constant 0 : i32
    return %c0_i32, %c0_i32_0 : i32, i32
  }
  func.func @transform_2(%arg0: i32) -> (i32, i32) {
    %c0_i32 = arith.constant 0 : i32
    %c0_i32_0 = arith.constant 0 : i32
    %c0_i32_1 = arith.constant 0 : i32
    return %c0_i32, %c0_i32_0 : i32, i32
  }
}

</mosaic_0001>

<bundles_post_ra>
// kernel: tpu_custom_call.1
= control target key start
LH: loop header
LB: loop body
LE: loop exit
PB: predicated region body
PF: predicated region fallthrough
CT: control target
= control target key end

     0   :  { %8 = vsyncpa [#allocation3], 0  ;;  %s282_s0 = inlined_call_operand.hbm [shape: f32[8,1024], index: 0, kind: input, shape index: {}]   ;;  %s283_s1 = inlined_call_operand.hbm [shape: f32[1,1], index: 1, kind: output, shape index: {0}]   ;;  %s284_s2 = inlined_call_operand.hbm [shape: f32[1,1], index: 2, kind: output, shape index: {1}]  }
   0x1   :  { %9 = vsyncpa [#allocation4], 0 }
   0x2   :  { %10 = vsyncpa [#allocation7], 0  ;;  %s16_s11 = sshll.u32 %s282_s0, 4  ;;  %s248_s12 = smov [#allocation2]   ;;  %s17_s11 = int_to_ptr.hbm [resolvable:$true] %s16_s11 }
   0x3   :  { %s18_s13 = sshll.u32 %s248_s12, 4  ;;  %s19_s13 = int_to_ptr.vmem [resolvable:$true] %s18_s13 }
   0x4   :  { %21 = dma.hbm_to_vmem [thread:$0]  %s17_s11, 1024, %s19_s13, [#allocation3]  }
   0x5   :  { %242 = dma.done.wait [#allocation3], 1024  }
   0x6   :  { %243 = vsyncadd [#allocation3], 4294966272  ;;  %vm30_vm0 = vcmask 0   ;;  %v249_v0 = vmov -inf   ;;  %v33_v1 = vld [vmem:[#allocation2] sm:$0xff]  ;;  %v34_v2 = vld [vmem:[#allocation2 + $0x8] sm:$0xff] }
   0x7   :  { %31 = vst.msk [vmem:[#allocation5] sm:$0x1] %vm30_vm0, %v249_v0  ;;  %v35_v3 = vld [vmem:[#allocation2 + $0x10] sm:$0xff]  ;;  %v36_v4 = vld [vmem:[#allocation2 + $0x18] sm:$0xff]  ;;  %v37_v5 = vld [vmem:[#allocation2 + $0x20] sm:$0xff]  ;;  %v250_v16 = vmov 0  }
   0x8   :  { %v38_v6 = vld [vmem:[#allocation2 + $0x28] sm:$0xff]  ;;  %v39_v7 = vld [vmem:[#allocation2 + $0x30] sm:$0xff]  ;;  %v40_v8 = vld [vmem:[#allocation2 + $0x38] sm:$0xff]  ;;  %v41_v9 = vmax.f32 %v33_v1, %v37_v5  ;;  %151 = vset.pattern.permute.xlu0 %v250_v16  ;;  %v251_v17 = vmov 0.0   ;;  %s119_s15 = sshll.u32 %s283_s1, 4  ;;  %s252_s16 = smov [#allocation5]   ;;  %s120_s15 = int_to_ptr.hbm [resolvable:$true] %s119_s15 }
   0x9   :  { %v42_v10 = vmax.f32 %v34_v2, %v38_v6  ;;  %v43_v11 = vmax.f32 %v35_v3, %v39_v7  ;;  %v44_v12 = vmax.f32 %v36_v4, %v40_v8  ;;  %32 = vst.msk [vmem:[#allocation6] sm:$0x1] %vm30_vm0, %v251_v17  ;;  %s117_s17 = sshll.u32 %s252_s16, 4  ;;  %s253_s18 = smov [#allocation6]   ;;  %s118_s17 = int_to_ptr.vmem [resolvable:$true] %s117_s17 }
   0xa   :  { %s128_s19 = sshll.u32 %s253_s18, 4  ;;  %s130_s1 = sshll.u32 %s284_s2, 4  ;;  %s129_s19 = int_to_ptr.vmem [resolvable:$true] %s128_s19  ;;  %s131_s1 = int_to_ptr.hbm [resolvable:$true] %s130_s1 }
   0xb   :  { %v45_v13 = vmax.f32 %v41_v9, %v42_v10  ;;  %v46_v14 = vmax.f32 %v43_v11, %v44_v12 }
   0xd   :  { %v47_v15 = vmax.f32 %v45_v13, %v46_v14 }
   0xe   :  { %v56_v24 = vld [vmem:[#allocation5] sm:$0x1] }
   0xf   :  { %48 = vmax.xlane.f32.xlu0 %v47_v15 }
  0x82   :  { %v49_v18 = vpop.xlane.xlu0 %48 }
  0x83   :  { %v50_v19 = vrot.slane %v49_v18, 4 }
  0x85   :  { %v51_v20 = vmax.f32 %v49_v18, %v50_v19 }
  0x87   :  { %v52_v21 = vrot.slane %v51_v20, 2 }
  0x89   :  { %v53_v22 = vmax.f32 %v51_v20, %v52_v21 }
  0x8b   :  { %v54_v23 = vrot.slane %v53_v22, 1 }
  0x8d   :  { %v55_v25 = vmax.f32 %v53_v22, %v54_v23 }
  0x8f   :  { %v57_v26 = vmax.f32 %v56_v24, %v55_v25 }
  0x91   :  { %v103_v27 = vsub.f32 %v56_v24, %v57_v26  ;;  %111 = vst.msk [vmem:[#allocation5] sm:$0x1] %vm30_vm0, %v57_v26  ;;  %v59_v28 = vperm.slane %v57_v26, 0 }
  0x92   :  { %122 = dma.vmem_to_hbm [thread:$0]  %s118_s17, 16, %s120_s15, [#allocation4]  }
  0x93   :  { %61 = vperm.xlu0 %151, %v59_v28   ;;  %v104_v61 = vmul.f32 1.442695, %v103_v27 }
 0x105   :  { %v62_v29 = vpop.permute.xlu0 %61 }
 0x106   :  { %v64_v30 = vsub.f32 %v33_v1, %v62_v29  ;;  %v65_v31 = vsub.f32 %v34_v2, %v62_v29  ;;  %v66_v32 = vsub.f32 %v35_v3, %v62_v29  ;;  %v67_v33 = vsub.f32 %v36_v4, %v62_v29  ;;  %v106_v4 = vld [vmem:[#allocation6] sm:$0x1] }
 0x107   :  { %v68_v37 = vsub.f32 %v37_v5, %v62_v29  ;;  %v69_v38 = vsub.f32 %v38_v6, %v62_v29  ;;  %v70_v40 = vsub.f32 %v39_v7, %v62_v29  ;;  %v71_v42 = vsub.f32 %v40_v8, %v62_v29 }
 0x108   :  { %v72_v34 = vmul.f32 1.442695, %v64_v30  ;;  %v74_v35 = vmul.f32 1.442695, %v65_v31  ;;  %v76_v36 = vmul.f32 1.442695, %v66_v32 }
 0x109   :  { %v78_v39 = vmul.f32 1.442695, %v67_v33  ;;  %v80_v41 = vmul.f32 1.442695, %v68_v37  ;;  %v82_v43 = vmul.f32 1.442695, %v69_v38 }
 0x10a   :  { %152 = vpow2.f32 %v72_v34  ;;  %v84_v46 = vmul.f32 1.442695, %v70_v40  ;;  %v86_v49 = vmul.f32 1.442695, %v71_v42 }
 0x10b   :  { %154 = vpow2.f32 %v74_v35 }
 0x10c   :  { %156 = vpow2.f32 %v76_v36 }
 0x10d   :  { %158 = vpow2.f32 %v78_v39 }
 0x10e   :  { %160 = vpow2.f32 %v80_v41 }
 0x10f   :  { %162 = vpow2.f32 %v82_v43 }
 0x110   :  { %v153_v44 = vpop.eup %152  ;;  %164 = vpow2.f32 %v84_v46 }
 0x111   :  { %v155_v45 = vpop.eup %154  ;;  %166 = vpow2.f32 %v86_v49 }
 0x112   :  { %v88_v47 = vadd.f32 %v155_v45, %v153_v44  ;;  %v157_v48 = vpop.eup %156  ;;  %168 = vpow2.f32 %v104_v61 }
 0x113   :  { %v159_v51 = vpop.eup %158 }
 0x114   :  { %v89_v50 = vadd.f32 %v157_v48, %v88_v47  ;;  %v161_v53 = vpop.eup %160 }
 0x115   :  { %v163_v55 = vpop.eup %162 }
 0x116   :  { %v90_v52 = vadd.f32 %v159_v51, %v89_v50  ;;  %v165_v57 = vpop.eup %164 }
 0x117   :  { %v167_v59 = vpop.eup %166 }
 0x118   :  { %v91_v54 = vadd.f32 %v161_v53, %v90_v52  ;;  %v169_v3 = vpop.eup %168 }
 0x119   :  { %v107_v6 = vmul.f32 %v169_v3, %v106_v4 }
 0x11a   :  { %v92_v56 = vadd.f32 %v163_v55, %v91_v54 }
 0x11c   :  { %v93_v58 = vadd.f32 %v165_v57, %v92_v56 }
 0x11e   :  { %v94_v60 = vadd.f32 %v167_v59, %v93_v58 }
 0x120   :  { %95 = vadd.xlane.f32.xlu1 %v94_v60 }
 0x193   :  { %v96_v62 = vpop.xlane.xlu1 %95 }
 0x194   :  { %v97_v63 = vrot.slane %v96_v62, 4 }
 0x196   :  { %v98_v0 = vadd.f32 %v97_v63, %v96_v62 }
 0x198   :  { %v99_v1 = vrot.slane %v98_v0, 2 }
 0x19a   :  { %v100_v2 = vadd.f32 %v99_v1, %v98_v0 }
 0x19c   :  { %v101_v5 = vrot.slane %v100_v2, 1 }
 0x19e   :  { %v102_v7 = vadd.f32 %v101_v5, %v100_v2 }
 0x1a0   :  { %v108_v8 = vadd.f32 %v107_v6, %v102_v7 }
 0x1a2   :  { %110 = vst.msk [vmem:[#allocation6] sm:$0x1] %vm30_vm0, %v108_v8 }
 0x1a3   :  { %133 = dma.vmem_to_hbm [thread:$0]  %s129_s19, 16, %s131_s1, [#allocation7]  }
 0x1a4   :  { %244 = dma.done.wait [#allocation4], 16  }
 0x1a5   :  { %245 = vsyncadd [#allocation4], 4294967280 }
 0x1a6   :  { %246 = dma.done.wait [#allocation7], 16  }
 0x1a7   :  { %247 = vsyncadd [#allocation7], 4294967280 }
 0x1a8   :  { %142 = vsyncpa [#allocation3], 1 }
 0x1a9   :  { %143 = vsyncpa [#allocation4], 1 }
 0x1aa   :  { %144 = vsyncpa [#allocation7], 1 }

</bundles_post_ra>
